<compile_context>
chip_gen: v6e
topology: v6e:2x2x1
jax: 0.10.0
libtpu: 0.0.40
codegen_flags: <defaults>
</compile_context>

<pallas_src>
import numpy as np
import jax
import jax.numpy as jnp
from jax.experimental import pallas as pl
from jax.experimental.pallas import tpu as pltpu

# ----- configuration (mirrors NHITSBlock.__init__ arguments) -----------------
INPUT_SIZE = 30          # backcast / insample length L
N_POOL_KERNEL = 4        # MaxPool1d kernel == stride, ceil_mode=True
POOLED_SIZE = int(np.ceil(INPUT_SIZE / N_POOL_KERNEL))   # n_time_in_pooled = 8
HIDDEN = 32              # hidden_size
N_MLP_LAYERS = 2         # n_mlp_layers
FORECAST_SIZE = 8        # horizon produced by the basis
N_KNOTS = 4              # forecast knots carried in theta
N_THETA = INPUT_SIZE + N_KNOTS                            # n_theta = 34
DTYPE = jnp.float32
# activation='ReLU', pooling_mode='MaxPool1d'

BATCH = 256              # rows per call (batched per perf review)
BATCH_TILE = 128         # rows per grid step (one MXU tile of rows)
PACKED_OUT = 128         # lane-dense packed output width (>= L + horizon)
assert INPUT_SIZE + FORECAST_SIZE <= PACKED_OUT
assert BATCH % BATCH_TILE == 0
assert N_MLP_LAYERS >= 2


# ----- Pallas kernel ----------------------------------------------------------
def nhits_block_kernel(x_ref, w01_ref, b01_ref, wh_ref, bh_ref,
                       wpack_ref, bpack_ref, out_ref):
    # MaxPool1d(k, stride=k, ceil_mode=True): input packed as (k, Btile, Lp)
    # (tail pre-padded with -inf). Reducing over the leading axis is a pure
    # per-lane VPU max of k slabs — no cross-sublane (XLU) reduce.
    pooled = x_ref[0]
    for j in range(1, N_POOL_KERNEL):
        pooled = jnp.maximum(pooled, x_ref[j])

    # First two Linears were folded offline (no activation between them in the
    # PyTorch Sequential), so the first in-kernel layer already carries ReLU.
    h = jnp.dot(pooled, w01_ref[...], preferred_element_type=jnp.float32)
    h = jnp.maximum(h + b01_ref[...], 0.0)

    # Remaining hidden Linear + ReLU layers (static unroll).
    for i in range(N_MLP_LAYERS - 1):
        h = jnp.dot(h, wh_ref[i], preferred_element_type=jnp.float32)
        h = jnp.maximum(h + bh_ref[i], 0.0)

    # Output projection with the IdentityBasis folded in and lane-padded to
    # PACKED_OUT columns: [0,L) backcast, [L, L+F) interpolated forecast,
    # rest zero. Single lane-dense (unmasked) store of (Btile, 128).
    out = jnp.dot(h, wpack_ref[...], preferred_element_type=jnp.float32)
    out_ref[...] = (out + bpack_ref[...]).astype(out_ref.dtype)


# ----- helpers ----------------------------------------------------------------
def linear_interp_matrix(n_in, n_out):
    """F.interpolate(mode='linear', align_corners=False) as a matmul matrix."""
    W = np.zeros((n_in, n_out), dtype=np.float32)
    scale = n_in / n_out
    for i in range(n_out):
        src = (i + 0.5) * scale - 0.5
        src = min(max(src, 0.0), n_in - 1)
        i0 = int(np.floor(src))
        i1 = min(i0 + 1, n_in - 1)
        w = src - i0
        W[i0, i] += (1.0 - w)
        W[i1, i] += w
    return W


def fold_params(params):
    """One-time offline algebraic folding (done in float64 numpy for accuracy).

    - Merge Linear(Lp,H) and the first Linear(H,H) (no activation between them).
    - Fold the IdentityBasis (theta split + interpolation matmul) into a single
      lane-packed output projection of width PACKED_OUT.
    """
    w0 = np.asarray(params["w0"], np.float64)      # (Lp, H)
    b0 = np.asarray(params["b0"], np.float64)      # (1, H)
    wh = np.asarray(params["wh"], np.float64)      # (n, H, H)
    bh = np.asarray(params["bh"], np.float64)      # (n, 1, H)
    wo = np.asarray(params["wo"], np.float64)      # (H, n_theta)
    bo = np.asarray(params["bo"], np.float64)      # (1, n_theta)
    wi = np.asarray(params["wi"], np.float64)      # (n_knots, forecast)

    w01 = w0 @ wh[0]
    b01 = b0 @ wh[0] + bh[0]

    wpack = np.zeros((HIDDEN, PACKED_OUT), np.float64)
    bpack = np.zeros((1, PACKED_OUT), np.float64)
    wpack[:, :INPUT_SIZE] = wo[:, :INPUT_SIZE]
    bpack[:, :INPUT_SIZE] = bo[:, :INPUT_SIZE]
    wpack[:, INPUT_SIZE:INPUT_SIZE + FORECAST_SIZE] = wo[:, INPUT_SIZE:] @ wi
    bpack[:, INPUT_SIZE:INPUT_SIZE + FORECAST_SIZE] = bo[:, INPUT_SIZE:] @ wi

    return {
        "w01": jnp.asarray(w01, DTYPE),
        "b01": jnp.asarray(b01, DTYPE),
        "wh": jnp.asarray(wh[1:], DTYPE),          # (n-1, H, H)
        "bh": jnp.asarray(bh[1:], DTYPE),          # (n-1, 1, H)
        "wpack": jnp.asarray(wpack, DTYPE),
        "bpack": jnp.asarray(bpack, DTYPE),
    }


@jax.jit
def nhits_block_forward(x, folded):
    B = x.shape[0]
    num_tiles = B // BATCH_TILE

    # ceil_mode padding + (k, B, Lp) packing; fused by XLA under this jit
    # rather than dispatched as separate eager ops.
    padded_len = POOLED_SIZE * N_POOL_KERNEL
    xp = jnp.pad(x, ((0, 0), (0, padded_len - INPUT_SIZE)),
                 constant_values=-jnp.inf)
    xk = xp.reshape(B, POOLED_SIZE, N_POOL_KERNEL).transpose(2, 0, 1)  # (k,B,Lp)

    def full_spec(a):
        # Full-array block with a constant index map: weight stays VMEM-resident
        # across grid steps.
        return pl.BlockSpec(a.shape, lambda i: (0,) * a.ndim)

    w01, b01 = folded["w01"], folded["b01"]
    whr, bhr = folded["wh"], folded["bh"]
    wpack, bpack = folded["wpack"], folded["bpack"]

    out = pl.pallas_call(
        nhits_block_kernel,
        out_shape=jax.ShapeDtypeStruct((B, PACKED_OUT), DTYPE),
        grid=(num_tiles,),
        in_specs=[
            pl.BlockSpec((N_POOL_KERNEL, BATCH_TILE, POOLED_SIZE),
                         lambda i: (0, i, 0)),
            full_spec(w01), full_spec(b01),
            full_spec(whr), full_spec(bhr),
            full_spec(wpack), full_spec(bpack),
        ],
        out_specs=pl.BlockSpec((BATCH_TILE, PACKED_OUT), lambda i: (i, 0)),
        compiler_params=pltpu.CompilerParams(
            dimension_semantics=("parallel",)),
    )(xk, w01, b01, whr, bhr, wpack, bpack)

    backcast = out[:, :INPUT_SIZE]
    forecast = out[:, INPUT_SIZE:INPUT_SIZE + FORECAST_SIZE]
    return backcast, forecast


def reference_forward(x, params):
    """Pure-JAX reference of the unfolded forward pass (correctness check)."""
    B = x.shape[0]
    padded_len = POOLED_SIZE * N_POOL_KERNEL
    xp = jnp.pad(x, ((0, 0), (0, padded_len - INPUT_SIZE)),
                 constant_values=-jnp.inf)
    pooled = jnp.max(xp.reshape(B, POOLED_SIZE, N_POOL_KERNEL), axis=-1)
    h = pooled @ params["w0"] + params["b0"]          # no activation (as in nn.Sequential)
    for i in range(N_MLP_LAYERS):
        h = jnp.maximum(h @ params["wh"][i] + params["bh"][i], 0.0)
    theta = h @ params["wo"] + params["bo"]
    backcast = theta[:, :INPUT_SIZE]
    forecast = theta[:, INPUT_SIZE:] @ params["wi"]
    return backcast, forecast


# ----- main -------------------------------------------------------------------
if __name__ == "__main__":
    key = jax.random.PRNGKey(0)
    ks = jax.random.split(key, 7)

    # Deterministic synthetic parameters (PyTorch Linear weights (out,in) are
    # conceptually pre-transposed here to (in,out) for row-major matmuls).
    params = {
        "w0": jax.random.normal(ks[0], (POOLED_SIZE, HIDDEN), DTYPE) * 0.1,
        "b0": jax.random.normal(ks[1], (1, HIDDEN), DTYPE) * 0.1,
        "wh": jax.random.normal(ks[2], (N_MLP_LAYERS, HIDDEN, HIDDEN), DTYPE) * 0.1,
        "bh": jax.random.normal(ks[3], (N_MLP_LAYERS, 1, HIDDEN), DTYPE) * 0.1,
        "wo": jax.random.normal(ks[4], (HIDDEN, N_THETA), DTYPE) * 0.1,
        "bo": jax.random.normal(ks[5], (1, N_THETA), DTYPE) * 0.1,
        "wi": jnp.asarray(linear_interp_matrix(N_KNOTS, FORECAST_SIZE)),
    }
    x = jax.random.normal(ks[6], (BATCH, INPUT_SIZE), DTYPE)

    folded = fold_params(params)

    backcast, forecast = nhits_block_forward(x, folded)
    jax.block_until_ready((backcast, forecast))

    ref_back, ref_fore = reference_forward(x, params)
    np.testing.assert_allclose(np.asarray(backcast), np.asarray(ref_back),
                               rtol=1e-4, atol=1e-5)
    np.testing.assert_allclose(np.asarray(forecast), np.asarray(ref_fore),
                               rtol=1e-4, atol=1e-5)
    assert backcast.shape == (BATCH, INPUT_SIZE)
    assert forecast.shape == (BATCH, FORECAST_SIZE)

    print("KERNEL_OK")
</pallas_src>

<mosaic_0001>
module attributes {stable_mosaic.version = 11 : i64} {
  func.func @nhits_block_kernel(%arg0: i32, %arg1: memref<4x128x8xf32, #tpu.memory_space<vmem>>, %arg2: memref<8x32xf32, #tpu.memory_space<vmem>>, %arg3: memref<1x32xf32, #tpu.memory_space<vmem>>, %arg4: memref<1x32x32xf32, #tpu.memory_space<vmem>>, %arg5: memref<1x1x32xf32, #tpu.memory_space<vmem>>, %arg6: memref<32x128xf32, #tpu.memory_space<vmem>>, %arg7: memref<1x128xf32, #tpu.memory_space<vmem>>, %arg8: memref<128x128xf32, #tpu.memory_space<vmem>>) attributes {dimension_semantics = [#tpu.dimension_semantics<parallel>], iteration_bounds = array<i64: 2>, scalar_prefetch = 0 : i64, scratch_operands = 0 : i64, tpu.core_type = #tpu.core_type<tc>, window_params = [{transform_indices = @transform_0, window_bounds = array<i64: 4, 128, 8>}, {pipeline_mode = #tpu.pipeline_mode<synchronous>, transform_indices = @transform_1, window_bounds = array<i64: 8, 32>}, {pipeline_mode = #tpu.pipeline_mode<synchronous>, transform_indices = @transform_2, window_bounds = array<i64: 1, 32>}, {pipeline_mode = #tpu.pipeline_mode<synchronous>, transform_indices = @transform_3, window_bounds = array<i64: 1, 32, 32>}, {pipeline_mode = #tpu.pipeline_mode<synchronous>, transform_indices = @transform_4, window_bounds = array<i64: 1, 1, 32>}, {pipeline_mode = #tpu.pipeline_mode<synchronous>, transform_indices = @transform_5, window_bounds = array<i64: 32, 128>}, {pipeline_mode = #tpu.pipeline_mode<synchronous>, transform_indices = @transform_6, window_bounds = array<i64: 1, 128>}, {transform_indices = @transform_7, window_bounds = array<i64: 128, 128>}]} {
    %c0 = arith.constant 0 : index
    %c0_0 = arith.constant 0 : index
    %c0_1 = arith.constant 0 : index
    %0 = vector.load %arg1[%c0, %c0_0, %c0_1] : memref<4x128x8xf32, #tpu.memory_space<vmem>>, vector<1x128x8xf32>
    %1 = vector.shape_cast %0 : vector<1x128x8xf32> to vector<128x8xf32>
    %c1 = arith.constant 1 : index
    %c0_2 = arith.constant 0 : index
    %c0_3 = arith.constant 0 : index
    %2 = vector.load %arg1[%c1, %c0_2, %c0_3] : memref<4x128x8xf32, #tpu.memory_space<vmem>>, vector<1x128x8xf32>
    %3 = vector.shape_cast %2 : vector<1x128x8xf32> to vector<128x8xf32>
    %4 = arith.maximumf %1, %3 : vector<128x8xf32>
    %c2 = arith.constant 2 : index
    %c0_4 = arith.constant 0 : index
    %c0_5 = arith.constant 0 : index
    %5 = vector.load %arg1[%c2, %c0_4, %c0_5] : memref<4x128x8xf32, #tpu.memory_space<vmem>>, vector<1x128x8xf32>
    %6 = vector.shape_cast %5 : vector<1x128x8xf32> to vector<128x8xf32>
    %7 = arith.maximumf %4, %6 : vector<128x8xf32>
    %c3 = arith.constant 3 : index
    %c0_6 = arith.constant 0 : index
    %c0_7 = arith.constant 0 : index
    %8 = vector.load %arg1[%c3, %c0_6, %c0_7] : memref<4x128x8xf32, #tpu.memory_space<vmem>>, vector<1x128x8xf32>
    %9 = vector.shape_cast %8 : vector<1x128x8xf32> to vector<128x8xf32>
    %10 = arith.maximumf %7, %9 : vector<128x8xf32>
    %c0_8 = arith.constant 0 : index
    %c0_9 = arith.constant 0 : index
    %11 = vector.load %arg2[%c0_8, %c0_9] : memref<8x32xf32, #tpu.memory_space<vmem>>, vector<8x32xf32>
    %cst = arith.constant dense<0.000000e+00> : vector<128x32xf32>
    %12 = tpu.matmul %10, %11, %cst {dimension_numbers = #tpu.dot_dimension_numbers<[1], [0], [0], [1], [0, 0, 1, 1], [], []>} : vector<128x8xf32>, vector<8x32xf32>, vector<128x32xf32> -> vector<128x32xf32>
    %c0_10 = arith.constant 0 : index
    %c0_11 = arith.constant 0 : index
    %13 = vector.load %arg3[%c0_10, %c0_11] : memref<1x32xf32, #tpu.memory_space<vmem>>, vector<1x32xf32>
    %14 = vector.broadcast %13 : vector<1x32xf32> to vector<128x32xf32>
    %15 = arith.addf %12, %14 : vector<128x32xf32>
    %cst_12 = arith.constant 0.000000e+00 : f32
    %16 = vector.broadcast %cst_12 : f32 to vector<128x32xf32>
    %17 = arith.maximumf %15, %16 : vector<128x32xf32>
    %c0_13 = arith.constant 0 : index
    %c0_14 = arith.constant 0 : index
    %c0_15 = arith.constant 0 : index
    %18 = vector.load %arg4[%c0_13, %c0_14, %c0_15] : memref<1x32x32xf32, #tpu.memory_space<vmem>>, vector<1x32x32xf32>
    %19 = vector.shape_cast %18 : vector<1x32x32xf32> to vector<32x32xf32>
    %cst_16 = arith.constant dense<0.000000e+00> : vector<128x32xf32>
    %20 = tpu.matmul %17, %19, %cst_16 {dimension_numbers = #tpu.dot_dimension_numbers<[1], [0], [0], [1], [0, 0, 1, 1], [], []>} : vector<128x32xf32>, vector<32x32xf32>, vector<128x32xf32> -> vector<128x32xf32>
    %c0_17 = arith.constant 0 : index
    %c0_18 = arith.constant 0 : index
    %c0_19 = arith.constant 0 : index
    %21 = vector.load %arg5[%c0_17, %c0_18, %c0_19] : memref<1x1x32xf32, #tpu.memory_space<vmem>>, vector<1x1x32xf32>
    %22 = vector.shape_cast %21 : vector<1x1x32xf32> to vector<1x32xf32>
    %23 = vector.broadcast %22 : vector<1x32xf32> to vector<128x32xf32>
    %24 = arith.addf %20, %23 : vector<128x32xf32>
    %cst_20 = arith.constant 0.000000e+00 : f32
    %25 = vector.broadcast %cst_20 : f32 to vector<128x32xf32>
    %26 = arith.maximumf %24, %25 : vector<128x32xf32>
    %c0_21 = arith.constant 0 : index
    %c0_22 = arith.constant 0 : index
    %27 = vector.load %arg6[%c0_21, %c0_22] : memref<32x128xf32, #tpu.memory_space<vmem>>, vector<32x128xf32>
    %cst_23 = arith.constant dense<0.000000e+00> : vector<128x128xf32>
    %28 = tpu.matmul %26, %27, %cst_23 {dimension_numbers = #tpu.dot_dimension_numbers<[1], [0], [0], [1], [0, 0, 1, 1], [], []>} : vector<128x32xf32>, vector<32x128xf32>, vector<128x128xf32> -> vector<128x128xf32>
    %c0_24 = arith.constant 0 : index
    %c0_25 = arith.constant 0 : index
    %29 = vector.load %arg7[%c0_24, %c0_25] : memref<1x128xf32, #tpu.memory_space<vmem>>, vector<1x128xf32>
    %30 = vector.broadcast %29 : vector<1x128xf32> to vector<128x128xf32>
    %31 = arith.addf %28, %30 : vector<128x128xf32>
    %c0_26 = arith.constant 0 : index
    %c0_27 = arith.constant 0 : index
    %32 = vector.load %arg8[%c0_26, %c0_27] : memref<128x128xf32, #tpu.memory_space<vmem>>, vector<128x128xf32>
    tpu.vector_store %arg8[%c0_26, %c0_27], %31 {strides = array<i32>} : memref<128x128xf32, #tpu.memory_space<vmem>>, vector<128x128xf32>,
    return
  }
  func.func @transform_0(%arg0: i32) -> (i32, i32, i32) {
    %c0_i32 = arith.constant 0 : i32
    %c0_i32_0 = arith.constant 0 : i32
    %c0_i32_1 = arith.constant 0 : i32
    return %c0_i32, %arg0, %c0_i32_0 : i32, i32, i32
  }
  func.func @transform_1(%arg0: i32) -> (i32, i32) {
    %c0_i32 = arith.constant 0 : i32
    %c0_i32_0 = arith.constant 0 : i32
    %c0_i32_1 = arith.constant 0 : i32
    return %c0_i32, %c0_i32_0 : i32, i32
  }
  func.func @transform_2(%arg0: i32) -> (i32, i32) {
    %c0_i32 = arith.constant 0 : i32
    %c0_i32_0 = arith.constant 0 : i32
    %c0_i32_1 = arith.constant 0 : i32
    return %c0_i32, %c0_i32_0 : i32, i32
  }
  func.func @transform_3(%arg0: i32) -> (i32, i32, i32) {
    %c0_i32 = arith.constant 0 : i32
    %c0_i32_0 = arith.constant 0 : i32
    %c0_i32_1 = arith.constant 0 : i32
    %c0_i32_2 = arith.constant 0 : i32
    return %c0_i32, %c0_i32_0, %c0_i32_1 : i32, i32, i32
  }
  func.func @transform_4(%arg0: i32) -> (i32, i32, i32) {
    %c0_i32 = arith.constant 0 : i32
    %c0_i32_0 = arith.constant 0 : i32
    %c0_i32_1 = arith.constant 0 : i32
    %c0_i32_2 = arith.constant 0 : i32
    return %c0_i32, %c0_i32_0, %c0_i32_1 : i32, i32, i32
  }
  func.func @transform_5(%arg0: i32) -> (i32, i32) {
    %c0_i32 = arith.constant 0 : i32
    %c0_i32_0 = arith.constant 0 : i32
    %c0_i32_1 = arith.constant 0 : i32
    return %c0_i32, %c0_i32_0 : i32, i32
  }
  func.func @transform_6(%arg0: i32) -> (i32, i32) {
    %c0_i32 = arith.constant 0 : i32
    %c0_i32_0 = arith.constant 0 : i32
    %c0_i32_1 = arith.constant 0 : i32
    return %c0_i32, %c0_i32_0 : i32, i32
  }
  func.func @transform_7(%arg0: i32) -> (i32, i32) {
    %c0_i32 = arith.constant 0 : i32
    %c0_i32_0 = arith.constant 0 : i32
    return %arg0, %c0_i32 : i32, i32
  }
}

</mosaic_0001>

<bundles_post_ra>
// kernel: nhits_block_forward.1
= control target key start
LH: loop header
LB: loop body
LE: loop exit
PB: predicated region body
PF: predicated region fallthrough
CT: control target
= control target key end

     0   :  { %s1755_s24 = smov 0   ;;  %s1757_s25 = smov 0   ;;  %s2111_s0 = inlined_call_operand.vmem [shape: f32[4,256,8], index: 0, kind: input, shape index: {}]   ;;  %s2112_s1 = inlined_call_operand.vmem [shape: f32[8,32], index: 1, kind: input, shape index: {}]   ;;  %s2113_s2 = inlined_call_operand.vmem [shape: f32[1,32], index: 2, kind: input, shape index: {}]   ;;  %s2114_s3 = inlined_call_operand.vmem [shape: f32[1,32,32], index: 3, kind: input, shape index: {}]   ;;  %s2115_s4 = inlined_call_operand.vmem [shape: f32[1,1,32], index: 4, kind: input, shape index: {}]   ;;  %s2116_s5 = inlined_call_operand.vmem [shape: f32[32,128], index: 5, kind: input, shape index: {}]   ;;  %s2117_s6 = inlined_call_operand.vmem [shape: f32[1,128], index: 6, kind: input, shape index: {}]   ;;  %s2118_s7 = inlined_call_operand.vmem [shape: f32[256,128], index: 7, kind: output, shape index: {}]  }
   0x1   :  { %s1759_s26 = smov 0  }
   0x2 LB: > { %s1405_s27 = sadd.s32 4294967295, %s1713_s26   ;;  %s1772_s28 = sadd.s32 1, %s1713_s26   ;;  %s1713_s26 = sphi %s1759_s26, %s2121_s26   ;;  %s1709_s25 = sphi %s1757_s25, %s2120_s25   ;;  %s1705_s24 = sphi %s1755_s24, %s2119_s24  }
   0x3   : > { %s21_s29 = ssub.s32 %s1713_s26, %s1772_s28  ;;  %s24_s30 = sadd.s32 1, %s1709_s25 }
   0x4   : > { %p22_p0 = scmp.eq.s32.totalorder %s21_s29, 0  ;;  %p31_p1 = scmp.ne.s32.totalorder %s1709_s25, %s1705_s24 }
   0x5   : > { %p32_p2 = scmp.eq.s32.totalorder %s1713_s26, 0  ;;  %p1408_p4 = scmp.ge.s32.totalorder %s1713_s26, 2 }
   0x6   : > { %s1781_s8 = scalar_select %p22_p0, %s1709_s25, %s24_s30  }
   0x7   : > { %p33_p3 = por %p32_p2, %p31_p1  ;;  %227 = sbr.rel (%p1408_p4) target bundleno = 48 (0x30), region = 40 }
   0xc   : > { %230 = sbr.rel (!%p33_p3) target bundleno = 48 (0x30), region = 44  ;;  %s232_s9 = sand.u32 (%p33_p3), 1, %s1709_s25  }
   0xd   : > { %s1517_s10 = sshll.u32 (%p33_p3), %s1713_s26, 7  ;;  %s1409_s11 = sshll.u32 (%p33_p3), %s232_s9, 9 }
   0xe   : > { %s1789_s14 = scalar_lea.vmem (%p33_p3), %s2111_s0, %s1517_s10  ;;  %s1794_s15 = scalar_lea.vmem (%p33_p3), [#allocation2], %s1409_s11 }
   0xf   : > { %v392_v0 = vld [vmem:[%s1789_s14] sm:$0xff] (%p33_p3)  ;;  %v394_v1 = vld [vmem:[%s1789_s14 + $0x8] sm:$0xff] (%p33_p3)  ;;  %v396_v2 = vld [vmem:[%s1789_s14 + $0x10] sm:$0xff] (%p33_p3) }
  0x10   : > { %393 = vst [vmem:[%s1794_s15] sm:$0xff] (%p33_p3), %v392_v0  ;;  %395 = vst [vmem:[%s1794_s15 + $0x8] sm:$0xff] (%p33_p3), %v394_v1  ;;  %v398_v3 = vld [vmem:[%s1789_s14 + $0x18] sm:$0xff] (%p33_p3)  ;;  %v400_v4 = vld [vmem:[%s1789_s14 + $0x20] sm:$0xff] (%p33_p3) }
  0x11   : > { %397 = vst [vmem:[%s1794_s15 + $0x10] sm:$0xff] %v396_v2  ;;  %v402_v5 = vld [vmem:[%s1789_s14 + $0x28] sm:$0xff]  ;;  %399 = vst [vmem:[%s1794_s15 + $0x18] sm:$0xff] %v398_v3  ;;  %v404_v6 = vld [vmem:[%s1789_s14 + $0x30] sm:$0xff] }
  0x12   : > { %401 = vst [vmem:[%s1794_s15 + $0x20] sm:$0xff] %v400_v4  ;;  %403 = vst [vmem:[%s1794_s15 + $0x28] sm:$0xff] %v402_v5  ;;  %v406_v7 = vld [vmem:[%s1789_s14 + $0x38] sm:$0xff]  ;;  %v408_v8 = vld [vmem:[%s1789_s14 + $0x40] sm:$0xff] }
  0x13   : > { %405 = vst [vmem:[%s1794_s15 + $0x30] sm:$0xff] %v404_v6  ;;  %407 = vst [vmem:[%s1794_s15 + $0x38] sm:$0xff] %v406_v7  ;;  %v410_v9 = vld [vmem:[%s1789_s14 + $0x48] sm:$0xff]  ;;  %v412_v10 = vld [vmem:[%s1789_s14 + $0x50] sm:$0xff] }
  0x14   : > { %409 = vst [vmem:[%s1794_s15 + $0x40] sm:$0xff] %v408_v8  ;;  %v414_v11 = vld [vmem:[%s1789_s14 + $0x58] sm:$0xff]  ;;  %411 = vst [vmem:[%s1794_s15 + $0x48] sm:$0xff] %v410_v9  ;;  %v416_v12 = vld [vmem:[%s1789_s14 + $0x60] sm:$0xff] }
  0x15   : > { %413 = vst [vmem:[%s1794_s15 + $0x50] sm:$0xff] %v412_v10  ;;  %415 = vst [vmem:[%s1794_s15 + $0x58] sm:$0xff] %v414_v11  ;;  %v418_v13 = vld [vmem:[%s1789_s14 + $0x68] sm:$0xff]  ;;  %v420_v14 = vld [vmem:[%s1789_s14 + $0x70] sm:$0xff] }
  0x16   : > { %417 = vst [vmem:[%s1794_s15 + $0x60] sm:$0xff] %v416_v12  ;;  %419 = vst [vmem:[%s1794_s15 + $0x68] sm:$0xff] %v418_v13  ;;  %v422_v15 = vld [vmem:[%s1789_s14 + $0x78] sm:$0xff]  ;;  %v424_v16 = vld [vmem:[%s1789_s14 + $0x100] sm:$0xff] }
  0x17   : > { %421 = vst [vmem:[%s1794_s15 + $0x70] sm:$0xff] %v420_v14  ;;  %v426_v17 = vld [vmem:[%s1789_s14 + $0x108] sm:$0xff]  ;;  %423 = vst [vmem:[%s1794_s15 + $0x78] sm:$0xff] %v422_v15  ;;  %v428_v18 = vld [vmem:[%s1789_s14 + $0x110] sm:$0xff] }
  0x18   : > { %425 = vst [vmem:[%s1794_s15 + $0x80] sm:$0xff] %v424_v16  ;;  %427 = vst [vmem:[%s1794_s15 + $0x88] sm:$0xff] %v426_v17  ;;  %v430_v19 = vld [vmem:[%s1789_s14 + $0x118] sm:$0xff]  ;;  %v432_v20 = vld [vmem:[%s1789_s14 + $0x120] sm:$0xff] }
  0x19   : > { %429 = vst [vmem:[%s1794_s15 + $0x90] sm:$0xff] %v428_v18  ;;  %431 = vst [vmem:[%s1794_s15 + $0x98] sm:$0xff] %v430_v19  ;;  %v434_v21 = vld [vmem:[%s1789_s14 + $0x128] sm:$0xff]  ;;  %v436_v22 = vld [vmem:[%s1789_s14 + $0x130] sm:$0xff] }
  0x1a   : > { %433 = vst [vmem:[%s1794_s15 + $0xa0] sm:$0xff] %v432_v20  ;;  %v438_v23 = vld [vmem:[%s1789_s14 + $0x138] sm:$0xff]  ;;  %435 = vst [vmem:[%s1794_s15 + $0xa8] sm:$0xff] %v434_v21  ;;  %v440_v24 = vld [vmem:[%s1789_s14 + $0x140] sm:$0xff] }
  0x1b   : > { %437 = vst [vmem:[%s1794_s15 + $0xb0] sm:$0xff] %v436_v22  ;;  %439 = vst [vmem:[%s1794_s15 + $0xb8] sm:$0xff] %v438_v23  ;;  %v442_v25 = vld [vmem:[%s1789_s14 + $0x148] sm:$0xff]  ;;  %v444_v26 = vld [vmem:[%s1789_s14 + $0x150] sm:$0xff] }
  0x1c   : > { %441 = vst [vmem:[%s1794_s15 + $0xc0] sm:$0xff] %v440_v24  ;;  %443 = vst [vmem:[%s1794_s15 + $0xc8] sm:$0xff] %v442_v25  ;;  %v446_v27 = vld [vmem:[%s1789_s14 + $0x158] sm:$0xff]  ;;  %v448_v28 = vld [vmem:[%s1789_s14 + $0x160] sm:$0xff] }
  0x1d   : > { %445 = vst [vmem:[%s1794_s15 + $0xd0] sm:$0xff] %v444_v26  ;;  %v450_v29 = vld [vmem:[%s1789_s14 + $0x168] sm:$0xff]  ;;  %447 = vst [vmem:[%s1794_s15 + $0xd8] sm:$0xff] %v446_v27  ;;  %v452_v30 = vld [vmem:[%s1789_s14 + $0x170] sm:$0xff] }
  0x1e   : > { %449 = vst [vmem:[%s1794_s15 + $0xe0] sm:$0xff] %v448_v28  ;;  %451 = vst [vmem:[%s1794_s15 + $0xe8] sm:$0xff] %v450_v29  ;;  %v454_v31 = vld [vmem:[%s1789_s14 + $0x178] sm:$0xff]  ;;  %v456_v32 = vld [vmem:[%s1789_s14 + $0x200] sm:$0xff] }
  0x1f   : > { %453 = vst [vmem:[%s1794_s15 + $0xf0] sm:$0xff] %v452_v30  ;;  %455 = vst [vmem:[%s1794_s15 + $0xf8] sm:$0xff] %v454_v31  ;;  %v458_v33 = vld [vmem:[%s1789_s14 + $0x208] sm:$0xff]  ;;  %v460_v34 = vld [vmem:[%s1789_s14 + $0x210] sm:$0xff] }
  0x20   : > { %457 = vst [vmem:[%s1794_s15 + $0x100] sm:$0xff] %v456_v32  ;;  %v462_v35 = vld [vmem:[%s1789_s14 + $0x218] sm:$0xff]  ;;  %459 = vst [vmem:[%s1794_s15 + $0x108] sm:$0xff] %v458_v33  ;;  %v464_v36 = vld [vmem:[%s1789_s14 + $0x220] sm:$0xff] }
  0x21   : > { %461 = vst [vmem:[%s1794_s15 + $0x110] sm:$0xff] %v460_v34  ;;  %463 = vst [vmem:[%s1794_s15 + $0x118] sm:$0xff] %v462_v35  ;;  %v466_v37 = vld [vmem:[%s1789_s14 + $0x228] sm:$0xff]  ;;  %v468_v38 = vld [vmem:[%s1789_s14 + $0x230] sm:$0xff] }
  0x22   : > { %465 = vst [vmem:[%s1794_s15 + $0x120] sm:$0xff] %v464_v36  ;;  %467 = vst [vmem:[%s1794_s15 + $0x128] sm:$0xff] %v466_v37  ;;  %v470_v39 = vld [vmem:[%s1789_s14 + $0x238] sm:$0xff]  ;;  %v472_v40 = vld [vmem:[%s1789_s14 + $0x240] sm:$0xff] }
  0x23   : > { %469 = vst [vmem:[%s1794_s15 + $0x130] sm:$0xff] %v468_v38  ;;  %v474_v41 = vld [vmem:[%s1789_s14 + $0x248] sm:$0xff]  ;;  %471 = vst [vmem:[%s1794_s15 + $0x138] sm:$0xff] %v470_v39  ;;  %v476_v42 = vld [vmem:[%s1789_s14 + $0x250] sm:$0xff] }
  0x24   : > { %473 = vst [vmem:[%s1794_s15 + $0x140] sm:$0xff] %v472_v40  ;;  %475 = vst [vmem:[%s1794_s15 + $0x148] sm:$0xff] %v474_v41  ;;  %v478_v43 = vld [vmem:[%s1789_s14 + $0x258] sm:$0xff]  ;;  %v480_v44 = vld [vmem:[%s1789_s14 + $0x260] sm:$0xff] }
  0x25   : > { %477 = vst [vmem:[%s1794_s15 + $0x150] sm:$0xff] %v476_v42  ;;  %479 = vst [vmem:[%s1794_s15 + $0x158] sm:$0xff] %v478_v43  ;;  %v482_v45 = vld [vmem:[%s1789_s14 + $0x268] sm:$0xff]  ;;  %v484_v46 = vld [vmem:[%s1789_s14 + $0x270] sm:$0xff] }
  0x26   : > { %481 = vst [vmem:[%s1794_s15 + $0x160] sm:$0xff] %v480_v44  ;;  %v486_v47 = vld [vmem:[%s1789_s14 + $0x278] sm:$0xff]  ;;  %483 = vst [vmem:[%s1794_s15 + $0x168] sm:$0xff] %v482_v45  ;;  %v488_v48 = vld [vmem:[%s1789_s14 + $0x300] sm:$0xff] }
  0x27   : > { %485 = vst [vmem:[%s1794_s15 + $0x170] sm:$0xff] %v484_v46  ;;  %487 = vst [vmem:[%s1794_s15 + $0x178] sm:$0xff] %v486_v47  ;;  %v490_v49 = vld [vmem:[%s1789_s14 + $0x308] sm:$0xff]  ;;  %v492_v50 = vld [vmem:[%s1789_s14 + $0x310] sm:$0xff] }
  0x28   : > { %489 = vst [vmem:[%s1794_s15 + $0x180] sm:$0xff] %v488_v48  ;;  %491 = vst [vmem:[%s1794_s15 + $0x188] sm:$0xff] %v490_v49  ;;  %v494_v51 = vld [vmem:[%s1789_s14 + $0x318] sm:$0xff]  ;;  %v496_v52 = vld [vmem:[%s1789_s14 + $0x320] sm:$0xff] }
  0x29   : > { %493 = vst [vmem:[%s1794_s15 + $0x190] sm:$0xff] %v492_v50  ;;  %v498_v53 = vld [vmem:[%s1789_s14 + $0x328] sm:$0xff]  ;;  %495 = vst [vmem:[%s1794_s15 + $0x198] sm:$0xff] %v494_v51  ;;  %v500_v54 = vld [vmem:[%s1789_s14 + $0x330] sm:$0xff] }
  0x2a   : > { %497 = vst [vmem:[%s1794_s15 + $0x1a0] sm:$0xff] %v496_v52  ;;  %499 = vst [vmem:[%s1794_s15 + $0x1a8] sm:$0xff] %v498_v53  ;;  %v502_v55 = vld [vmem:[%s1789_s14 + $0x338] sm:$0xff]  ;;  %v504_v56 = vld [vmem:[%s1789_s14 + $0x340] sm:$0xff] }
  0x2b   : > { %501 = vst [vmem:[%s1794_s15 + $0x1b0] sm:$0xff] %v500_v54  ;;  %503 = vst [vmem:[%s1794_s15 + $0x1b8] sm:$0xff] %v502_v55  ;;  %v506_v57 = vld [vmem:[%s1789_s14 + $0x348] sm:$0xff]  ;;  %v508_v58 = vld [vmem:[%s1789_s14 + $0x350] sm:$0xff] }
  0x2c   : > { %505 = vst [vmem:[%s1794_s15 + $0x1c0] sm:$0xff] %v504_v56  ;;  %v510_v59 = vld [vmem:[%s1789_s14 + $0x358] sm:$0xff]  ;;  %507 = vst [vmem:[%s1794_s15 + $0x1c8] sm:$0xff] %v506_v57  ;;  %v512_v60 = vld [vmem:[%s1789_s14 + $0x360] sm:$0xff] }
  0x2d   : > { %509 = vst [vmem:[%s1794_s15 + $0x1d0] sm:$0xff] %v508_v58  ;;  %511 = vst [vmem:[%s1794_s15 + $0x1d8] sm:$0xff] %v510_v59  ;;  %v514_v61 = vld [vmem:[%s1789_s14 + $0x368] sm:$0xff]  ;;  %v516_v62 = vld [vmem:[%s1789_s14 + $0x370] sm:$0xff] }
  0x2e   : > { %513 = vst [vmem:[%s1794_s15 + $0x1e0] sm:$0xff] %v512_v60  ;;  %515 = vst [vmem:[%s1794_s15 + $0x1e8] sm:$0xff] %v514_v61  ;;  %v518_v63 = vld [vmem:[%s1789_s14 + $0x378] sm:$0xff] }
  0x2f   : > { %517 = vst [vmem:[%s1794_s15 + $0x1f0] sm:$0xff] %v516_v62  ;;  %519 = vst [vmem:[%s1794_s15 + $0x1f8] sm:$0xff] %v518_v63 }
  0x30 PF: > { %p1412_p5 = scmp.ge.s32.totalorder %s1713_s26, 1  ;;  %p524_p6 = scmp.lt.s32.totalorder %s1713_s26, 3 }
  0x32   : > { %p525_p7 = pnand %p1412_p5, %p524_p6 }
  0x33   : > { %s531_s18 = sand.u32 (!%p525_p7), 1, %s1705_s24   ;;  %s1414_s23 = sshll.u32 (!%p525_p7), %s1405_s27, 4 }
  0x34   : > { %528 = sbr.rel (%p525_p7) target bundleno = 693 (0x2b5), region = 82  ;;  %s1413_s21 = sshll.u32 (!%p525_p7), %s531_s18, 9 }
  0x35   : > { %s1932_s22 = scalar_lea.vmem (!%p525_p7), [#allocation2], %s1413_s21  ;;  %p564_p8 = scmp.lt.s32.totalorder (!%p525_p7), %s1414_s23, 31 }
  0x39   : > { %v684_v0 = vld [vmem:[%s2112_s1] sm:$0xff]  ;;  %v1930_v1 = vld [vmem:[%s2114_s3 + $0x18] sm:$0xff]  ;;  %v570_v6 = vld [vmem:[%s1932_s22 + $0x8] sm:$0xff]  ;;  %vm692_vm0 = vcmask 64512   ;;  %vm913_vm1 = vcmask 261120   ;;  %s2123_s23 = smov (!%p564_p8, %s1414_s23), 31 }
  0x3a   : > { %1575 = vmatprep.subr.mxu0 %v684_v0  ;;  %1665 = vmatprep.subr.mxu1 %v684_v0  ;;  %v569_v2 = vld [vmem:[%s1932_s22] sm:$0xff]  ;;  %v1417_v7 = vld [vmem:[%s1932_s22 + $0x88] sm:$0xff]  ;;  %v571_v11 = vld [vmem:[%s1932_s22 + $0x10] sm:$0xff]  ;;  %s1415_s24 = sshll.u32 %s2123_s23, 3 }
  0x3b   : > { %1576 = vmatpush3.msra.mxu0 %v684_v0  ;;  %1666 = vmatpush3.msra.mxu1 %v684_v0  ;;  %v1416_v3 = vld [vmem:[%s1932_s22 + $0x80] sm:$0xff]  ;;  %v603_v9 = vmax.f32 %v570_v6, %v1417_v7  ;;  %v1433_v10 = vld [vmem:[%s1932_s22 + $0x108] sm:$0xff]  ;;  %v1418_v14 = vld [vmem:[%s1932_s22 + $0x90] sm:$0xff]  ;;  %s2083_s11 = scalar_lea.vmem %s2118_s7, %s1415_s24 }
  0x3c   : > { %v1432_v4 = vld [vmem:[%s1932_s22 + $0x100] sm:$0xff]  ;;  %1601 = vmatprep.subr.mxu1 %v1930_v1  ;;  %v602_v5 = vmax.f32 %v569_v2, %v1416_v3  ;;  %v1449_v13 = vld [vmem:[%s1932_s22 + $0x188] sm:$0xff]  ;;  %v1434_v15 = vld [vmem:[%s1932_s22 + $0x110] sm:$0xff]  ;;  %v604_v17 = vmax.f32 %v571_v11, %v1418_v14 }
  0x3d   : > { %v1448_v8 = vld [vmem:[%s1932_s22 + $0x180] sm:$0xff]  ;;  %v636_v16 = vmax.f32 %v603_v9, %v1433_v10  ;;  %v572_v18 = vld [vmem:[%s1932_s22 + $0x18] sm:$0xff]  ;;  %v1450_v22 = vld [vmem:[%s1932_s22 + $0x190] sm:$0xff] }
  0x3e   : > { %v635_v12 = vmax.f32 %v602_v5, %v1432_v4  ;;  %v1419_v19 = vld [vmem:[%s1932_s22 + $0x98] sm:$0xff]  ;;  %v573_v24 = vld [vmem:[%s1932_s22 + $0x20] sm:$0xff]  ;;  %v637_v27 = vmax.f32 %v604_v17, %v1434_v15  ;;  %v574_v31 = vld [vmem:[%s1932_s22 + $0x28] sm:$0xff] }
  0x3f   : > { %v1435_v20 = vld [vmem:[%s1932_s22 + $0x118] sm:$0xff]  ;;  %v605_v23 = vmax.f32 %v572_v18, %v1419_v19  ;;  %v1420_v25 = vld [vmem:[%s1932_s22 + $0xa0] sm:$0xff]  ;;  %v669_v26 = vmax.f32 %v636_v16, %v1449_v13  ;;  %v1421_v34 = vld [vmem:[%s1932_s22 + $0xa8] sm:$0xff] }
  0x40   : > { %v668_v21 = vmax.f32 %v635_v12, %v1448_v8  ;;  %v1451_v28 = vld [vmem:[%s1932_s22 + $0x198] sm:$0xff]  ;;  %v606_v29 = vmax.f32 %v573_v24, %v1420_v25  ;;  %v1436_v30 = vld [vmem:[%s1932_s22 + $0x120] sm:$0xff]  ;;  %v1437_v35 = vld [vmem:[%s1932_s22 + $0x128] sm:$0xff]  ;;  %v670_v36 = vmax.f32 %v637_v27, %v1450_v22  ;;  %v607_v38 = vmax.f32 %v574_v31, %v1421_v34 }
  0x41   : > { %v638_v32 = vmax.f32 %v605_v23, %v1435_v20  ;;  %v1452_v33 = vld [vmem:[%s1932_s22 + $0x1a0] sm:$0xff]  ;;  %v575_v39 = vld [vmem:[%s1932_s22 + $0x30] sm:$0xff]  ;;  %v1453_v43 = vld [vmem:[%s1932_s22 + $0x1a8] sm:$0xff] }
  0x42   : > { %1577 = vmatprep.mubr.msk.f32.mxu0 %vm692_vm0, %v668_v21  ;;  %v639_v37 = vmax.f32 %v606_v29, %v1436_v30  ;;  %v1422_v40 = vld [vmem:[%s1932_s22 + $0xb0] sm:$0xff]  ;;  %v576_v45 = vld [vmem:[%s1932_s22 + $0x38] sm:$0xff]  ;;  %v640_v48 = vmax.f32 %v607_v38, %v1437_v35  ;;  %v577_v52 = vld [vmem:[%s1932_s22 + $0x40] sm:$0xff] }
  0x43   : > { %1578 = vmatmul.mubr.msk.f32.vlgmr.msra.gmra.mxu0 %vm692_vm0, %v669_v26  ;;  %v1438_v41 = vld [vmem:[%s1932_s22 + $0x130] sm:$0xff]  ;;  %v671_v42 = vmax.f32 %v638_v32, %v1451_v28  ;;  %v608_v44 = vmax.f32 %v575_v39, %v1422_v40  ;;  %v1423_v46 = vld [vmem:[%s1932_s22 + $0xb8] sm:$0xff]  ;;  %v1424_v55 = vld [vmem:[%s1932_s22 + $0xc0] sm:$0xff] }
  0x44   : > { %1580 = vmatprep.mubr.msk.f32.mxu0 %vm692_vm0, %v670_v36  ;;  %v672_v47 = vmax.f32 %v639_v37, %v1452_v33  ;;  %v1454_v49 = vld [vmem:[%s1932_s22 + $0x1b0] sm:$0xff]  ;;  %v609_v50 = vmax.f32 %v576_v45, %v1423_v46  ;;  %v1439_v51 = vld [vmem:[%s1932_s22 + $0x138] sm:$0xff]  ;;  %v1440_v56 = vld [vmem:[%s1932_s22 + $0x140] sm:$0xff]  ;;  %v673_v57 = vmax.f32 %v640_v48, %v1453_v43  ;;  %v610_v59 = vmax.f32 %v577_v52, %v1424_v55 }
  0x45   : > { %v641_v53 = vmax.f32 %v608_v44, %v1438_v41  ;;  %v1455_v54 = vld [vmem:[%s1932_s22 + $0x1b8] sm:$0xff]  ;;  %v578_v60 = vld [vmem:[%s1932_s22 + $0x48] sm:$0xff]  ;;  %v1456_v0 = vld [vmem:[%s1932_s22 + $0x1c0] sm:$0xff] }
  0x46   : > { %v642_v58 = vmax.f32 %v609_v50, %v1439_v51  ;;  %v1425_v61 = vld [vmem:[%s1932_s22 + $0xc8] sm:$0xff]  ;;  %v579_v3 = vld [vmem:[%s1932_s22 + $0x50] sm:$0xff]  ;;  %v643_v5 = vmax.f32 %v610_v59, %v1440_v56  ;;  %v580_v9 = vld [vmem:[%s1932_s22 + $0x58] sm:$0xff] }
  0x47   : > { %1581 = vmatmul.mubr.msk.f32.gmra.mxu0 %vm692_vm0, %v671_v42  ;;  %v1441_v62 = vld [vmem:[%s1932_s22 + $0x148] sm:$0xff]  ;;  %v674_v63 = vmax.f32 %v641_v53, %v1454_v49  ;;  %v611_v2 = vmax.f32 %v578_v60, %v1425_v61  ;;  %v1426_v4 = vld [vmem:[%s1932_s22 + $0xd0] sm:$0xff]  ;;  %v1427_v12 = vld [vmem:[%s1932_s22 + $0xd8] sm:$0xff] }
  0x48   : > { %1583 = vmatprep.mubr.msk.f32.mxu0 %vm692_vm0, %v672_v47  ;;  %v1457_v6 = vld [vmem:[%s1932_s22 + $0x1c8] sm:$0xff]  ;;  %v612_v7 = vmax.f32 %v579_v3, %v1426_v4  ;;  %v1442_v8 = vld [vmem:[%s1932_s22 + $0x150] sm:$0xff]  ;;  %v1443_v13 = vld [vmem:[%s1932_s22 + $0x158] sm:$0xff]  ;;  %v675_v14 = vmax.f32 %v642_v58, %v1455_v54  ;;  %v676_v15 = vmax.f32 %v643_v5, %v1456_v0  ;;  %v613_v17 = vmax.f32 %v580_v9, %v1427_v12 }
  0x49   : > { %v644_v10 = vmax.f32 %v611_v2, %v1441_v62  ;;  %v1458_v11 = vld [vmem:[%s1932_s22 + $0x1d0] sm:$0xff]  ;;  %v581_v18 = vld [vmem:[%s1932_s22 + $0x60] sm:$0xff]  ;;  %v1459_v22 = vld [vmem:[%s1932_s22 + $0x1d8] sm:$0xff] }
  0x4a   : > { %v645_v16 = vmax.f32 %v612_v7, %v1442_v8  ;;  %v1428_v19 = vld [vmem:[%s1932_s22 + $0xe0] sm:$0xff]  ;;  %v582_v24 = vld [vmem:[%s1932_s22 + $0x68] sm:$0xff]  ;;  %v904_v26 = vld [vmem:[%s2114_s3 + $0x10] sm:$0xff]  ;;  %1589 = vmatprep.mubr.msk.f32.mxu1 %vm692_vm0, %v676_v15  ;;  %v646_v28 = vmax.f32 %v613_v17, %v1443_v13 }
  0x4b   : > { %1584 = vmatmul.mubr.msk.f32.gmra.mxu0 %vm692_vm0, %v673_v57  ;;  %v1444_v20 = vld [vmem:[%s1932_s22 + $0x160] sm:$0xff]  ;;  %v677_v21 = vmax.f32 %v644_v10, %v1457_v6  ;;  %v614_v23 = vmax.f32 %v581_v18, %v1428_v19  ;;  %v1429_v25 = vld [vmem:[%s1932_s22 + $0xe8] sm:$0xff]  ;;  %v583_v32 = vld [vmem:[%s1932_s22 + $0x70] sm:$0xff] }
  0x4c   : > { %1586 = vmatprep.mubr.msk.f32.mxu0 %vm692_vm0, %v674_v63  ;;  %v678_v27 = vmax.f32 %v645_v16, %v1458_v11  ;;  %v1460_v29 = vld [vmem:[%s1932_s22 + $0x1e0] sm:$0xff]  ;;  %v615_v30 = vmax.f32 %v582_v24, %v1429_v25  ;;  %v1445_v31 = vld [vmem:[%s1932_s22 + $0x168] sm:$0xff]  ;;  %v1430_v35 = vld [vmem:[%s1932_s22 + $0xf0] sm:$0xff]  ;;  %v679_v37 = vmax.f32 %v646_v28, %v1459_v22 }
  0x4d   : > { %1590 = vmatmul.mubr.msk.f32.vlgmr.msra.gmra.mxu1 %vm692_vm0, %v677_v21  ;;  %v647_v33 = vmax.f32 %v614_v23, %v1444_v20  ;;  %v1461_v34 = vld [vmem:[%s1932_s22 + $0x1e8] sm:$0xff]  ;;  %v1446_v36 = vld [vmem:[%s1932_s22 + $0x170] sm:$0xff]  ;;  %v616_v39 = vmax.f32 %v583_v32, %v1430_v35  ;;  %v584_v40 = vld [vmem:[%s1932_s22 + $0x78] sm:$0xff] }
  0x4e   : > { %1592 = vmatprep.mubr.msk.f32.mxu1 %vm692_vm0, %v678_v27  ;;  %v648_v38 = vmax.f32 %v615_v30, %v1445_v31  ;;  %v1431_v41 = vld [vmem:[%s1932_s22 + $0xf8] sm:$0xff]  ;;  %v1462_v44 = vld [vmem:[%s1932_s22 + $0x1f0] sm:$0xff]  ;;  %1602 = vmatpush3.msra.mxu1 %v1930_v1  ;;  %v903_v47 = vld [vmem:[%s2114_s3 + $0x8] sm:$0xff] }
  0x4f   : > { %1587 = vmatmul.mubr.msk.f32.gmra.mxu0 %vm692_vm0, %v675_v14  ;;  %v1447_v42 = vld [vmem:[%s1932_s22 + $0x178] sm:$0xff]  ;;  %v680_v43 = vmax.f32 %v647_v33, %v1460_v29  ;;  %v617_v45 = vmax.f32 %v584_v40, %v1431_v41  ;;  %v649_v46 = vmax.f32 %v616_v39, %v1446_v36  ;;  %1603 = vmatprep.subr.mxu1 %v904_v26  ;;  %v902_v52 = vld [vmem:[%s2114_s3] sm:$0xff]  ;;  %v1125_v54 = vld [vmem:[%s2116_s5 + $0x10] sm:$0xff] }
  0x50   : > { %v681_v48 = vmax.f32 %v648_v38, %v1461_v34  ;;  %v1463_v51 = vld [vmem:[%s1932_s22 + $0x1f8] sm:$0xff]  ;;  %1604 = vmatpush3.msra.mxu1 %v904_v26  ;;  %v1124_v55 = vld [vmem:[%s2116_s5 + $0x8] sm:$0xff]  ;;  %v1464_v56 = vld [vmem:[%s2113_s2] ss:$0 sm:$0xff] }
  0x51   : > { %1593 = vmatmul.mubr.msk.f32.gmra.mxu1 %vm692_vm0, %v679_v37  ;;  %v650_v49 = vmax.f32 %v617_v45, %v1447_v42  ;;  %v682_v50 = vmax.f32 %v649_v46, %v1462_v44  ;;  %1605 = vmatprep.subr.mxu1 %v903_v47  ;;  %v1126_v53 = vld [vmem:[%s2116_s5 + $0x18] sm:$0xff]  ;;  %v1123_v42 = vld [vmem:[%s2116_s5] sm:$0xff] }
  0x52   : > { %1595 = vmatprep.mubr.msk.f32.mxu1 %vm692_vm0, %v680_v43  ;;  %1606 = vmatpush3.msra.mxu1 %v903_v47  ;;  %v1481_v43 = vld [vmem:[%s2115_s4] ss:$0 sm:$0xff] }
  0x53   : > { %v683_v1 = vmax.f32 %v650_v49, %v1463_v51  ;;  %1607 = vmatprep.subr.mxu1 %v902_v52  ;;  %1633 = vmatprep.subr.mxu0 %v1126_v53 }
  0x54   : > { %1608 = vmatpush3.msra.mxu1 %v902_v52  ;;  %1634 = vmatpush3.msra.mxu0 %v1126_v53 }
  0x55   : > { %1596 = vmatmul.mubr.msk.f32.gmra.mxu1 %vm692_vm0, %v681_v48  ;;  %1635 = vmatprep.subr.mxu0 %v1125_v54 }
  0x56   : > { %1598 = vmatprep.mubr.msk.f32.mxu1 %vm692_vm0, %v682_v50  ;;  %1636 = vmatpush3.msra.mxu0 %v1125_v54 }
  0x57   : > { %1637 = vmatprep.subr.mxu0 %v1124_v55 }
  0x58   : > { %1638 = vmatpush3.msra.mxu0 %v1124_v55 }
  0x59   : > { %1599 = vmatmul.mubr.msk.f32.gmra.mxu1 %vm692_vm0, %v683_v1  ;;  %1639 = vmatprep.subr.mxu0 %v1123_v42 }
  0x5a   : > { %1640 = vmatpush3.msra.mxu0 %v1123_v42 }
 0x103   : > { %v1579_v57 = vpop.f32.mrf.mxu0 }
 0x104   : > { %v813_v58 = vadd.f32 %v1579_v57, %v1464_v56 }
 0x105   : > { %v807_v59 = vpop.f32.mrf.mxu0 }
 0x106   : > { %v808_v60 = vadd.f32 %v1464_v56, %v807_v59  ;;  %v887_v63 = vmax.f32 %v813_v58, 0.0 }
 0x107   : > { %v1582_v61 = vpop.f32.mrf.mxu0 }
 0x108   : > { %v886_v62 = vmax.f32 %v808_v60, 0.0  ;;  %v823_v0 = vadd.f32 %v1582_v61, %v1464_v56 }
 0x109   : > { %v817_v2 = vpop.f32.mrf.mxu0 }
 0x10a   : > { %v818_v3 = vadd.f32 %v1464_v56, %v817_v2  ;;  %1609 = vmatprep.mubr.msk.f32.mxu1 %vm913_vm1, %v886_v62  ;;  %v889_v6 = vmax.f32 %v823_v0, 0.0 }
 0x10b   : > { %v1585_v4 = vpop.f32.mrf.mxu0  ;;  %1610 = vmatmul.mubr.msk.f32.vlgmr.msra.gmra.mxu1 %vm913_vm1, %v887_v63 }
 0x10c   : > { %v888_v5 = vmax.f32 %v818_v3, 0.0  ;;  %v833_v7 = vadd.f32 %v1585_v4, %v1464_v56 }
 0x10d   : > { %v827_v8 = vpop.f32.mrf.mxu0  ;;  %v1591_v10 = vpop.f32.mrf.mxu1 }
 0x10e   : > { %v828_v9 = vadd.f32 %v1464_v56, %v827_v8  ;;  %1612 = vmatprep.mubr.msk.f32.mxu1 %vm913_vm1, %v888_v5  ;;  %v891_v14 = vmax.f32 %v833_v7, 0.0  ;;  %v853_v24 = vadd.f32 %v1591_v10, %v1464_v56 }
 0x10f   : > { %v1588_v11 = vpop.f32.mrf.mxu0  ;;  %1613 = vmatmul.mubr.msk.f32.gmra.mxu1 %vm913_vm1, %v889_v6  ;;  %v847_v13 = vpop.f32.mrf.mxu1 }
 0x110   : > { %v890_v12 = vmax.f32 %v828_v9, 0.0  ;;  %v843_v15 = vadd.f32 %v1588_v11, %v1464_v56  ;;  %v848_v17 = vadd.f32 %v1464_v56, %v847_v13  ;;  %v895_v29 = vmax.f32 %v853_v24, 0.0 }
 0x111   : > { %v837_v16 = vpop.f32.mrf.mxu0  ;;  %v1594_v19 = vpop.f32.mrf.mxu1 }
 0x112   : > { %v838_v18 = vadd.f32 %v1464_v56, %v837_v16  ;;  %1615 = vmatprep.mubr.msk.f32.mxu1 %vm913_vm1, %v890_v12  ;;  %v894_v21 = vmax.f32 %v848_v17, 0.0  ;;  %v893_v23 = vmax.f32 %v843_v15, 0.0  ;;  %v863_v30 = vadd.f32 %v1594_v19, %v1464_v56 }
 0x113   : > { %1616 = vmatmul.mubr.msk.f32.gmra.mxu1 %vm913_vm1, %v891_v14  ;;  %v857_v22 = vpop.f32.mrf.mxu1 }
 0x114   : > { %v892_v20 = vmax.f32 %v838_v18, 0.0  ;;  %v858_v25 = vadd.f32 %v1464_v56, %v857_v22  ;;  %v897_v35 = vmax.f32 %v863_v30, 0.0 }
 0x115   : > { %v1597_v26 = vpop.f32.mrf.mxu1 }
 0x116   : > { %1618 = vmatprep.mubr.msk.f32.mxu1 %vm913_vm1, %v892_v20  ;;  %v896_v27 = vmax.f32 %v858_v25, 0.0  ;;  %v873_v36 = vadd.f32 %v1597_v26, %v1464_v56 }
 0x117   : > { %1619 = vmatmul.mubr.msk.f32.gmra.mxu1 %vm913_vm1, %v893_v23  ;;  %v867_v28 = vpop.f32.mrf.mxu1 }
 0x118   : > { %1621 = vmatprep.mubr.msk.f32.mxu1 %vm913_vm1, %v894_v21  ;;  %v868_v31 = vadd.f32 %v1464_v56, %v867_v28  ;;  %v899_v39 = vmax.f32 %v873_v36, 0.0  ;;  %v1498_v28 = vld [vmem:[%s2117_s6] ss:$0 sm:$0xff] }
 0x119   : > { %v1600_v32 = vpop.f32.mrf.mxu1 }
 0x11a   : > { %v898_v33 = vmax.f32 %v868_v31, 0.0  ;;  %v883_v40 = vadd.f32 %v1600_v32, %v1464_v56 }
 0x11b   : > { %1622 = vmatmul.mubr.msk.f32.gmra.mxu1 %vm913_vm1, %v895_v29  ;;  %v877_v34 = vpop.f32.mrf.mxu1 }
 0x11c   : > { %1624 = vmatprep.mubr.msk.f32.mxu1 %vm913_vm1, %v896_v27  ;;  %v878_v37 = vadd.f32 %v1464_v56, %v877_v34  ;;  %v901_v41 = vmax.f32 %v883_v40, 0.0 }
 0x11e   : > { %v900_v38 = vmax.f32 %v878_v37, 0.0 }
 0x11f   : > { %1625 = vmatmul.mubr.msk.f32.gmra.mxu1 %vm913_vm1, %v897_v35 }
 0x120   : > { %1627 = vmatprep.mubr.msk.f32.mxu1 %vm913_vm1, %v898_v33 }
 0x123   : > { %1628 = vmatmul.mubr.msk.f32.gmra.mxu1 %vm913_vm1, %v899_v39 }
 0x124   : > { %1630 = vmatprep.mubr.msk.f32.mxu1 %vm913_vm1, %v900_v38 }
 0x127   : > { %1631 = vmatmul.mubr.msk.f32.gmra.mxu1 %vm913_vm1, %v901_v41 }
 0x1cb   : > { %v1611_v44 = vpop.f32.mrf.mxu1 }
 0x1cc   : > { %v1034_v45 = vadd.f32 %v1611_v44, %v1481_v43 }
 0x1cd   : > { %v1028_v46 = vpop.f32.mrf.mxu1 }
 0x1ce   : > { %v1029_v47 = vadd.f32 %v1481_v43, %v1028_v46  ;;  %v1108_v50 = vmax.f32 %v1034_v45, 0.0 }
 0x1cf   : > { %v1614_v48 = vpop.f32.mrf.mxu1 }
 0x1d0   : > { %v1107_v49 = vmax.f32 %v1029_v47, 0.0  ;;  %v1044_v51 = vadd.f32 %v1614_v48, %v1481_v43 }
 0x1d1   : > { %v1038_v1 = vpop.f32.mrf.mxu1 }
 0x1d2   : > { %v1039_v52 = vadd.f32 %v1481_v43, %v1038_v1  ;;  %1641 = vmatprep.mubr.msk.f32.mxu0 %vm913_vm1, %v1107_v49  ;;  %v1110_v55 = vmax.f32 %v1044_v51, 0.0 }
 0x1d3   : > { %v1617_v53 = vpop.f32.mrf.mxu1  ;;  %1642 = vmatmul.mubr.msk.f32.vlgmr.msra.gmra.mxu0 %vm913_vm1, %v1108_v50 }
 0x1d4   : > { %v1109_v54 = vmax.f32 %v1039_v52, 0.0  ;;  %v1054_v56 = vadd.f32 %v1617_v53, %v1481_v43 }
 0x1d5   : > { %v1048_v57 = vpop.f32.mrf.mxu1 }
 0x1d6   : > { %v1049_v58 = vadd.f32 %v1481_v43, %v1048_v57  ;;  %1644 = vmatprep.mubr.msk.f32.mxu0 %vm913_vm1, %v1109_v54  ;;  %v1112_v61 = vmax.f32 %v1054_v56, 0.0 }
 0x1d7   : > { %v1620_v59 = vpop.f32.mrf.mxu1  ;;  %1645 = vmatmul.mubr.msk.f32.gmra.mxu0 %vm913_vm1, %v1110_v55 }
 0x1d8   : > { %v1111_v60 = vmax.f32 %v1049_v58, 0.0  ;;  %v1064_v62 = vadd.f32 %v1620_v59, %v1481_v43 }
 0x1d9   : > { %v1058_v63 = vpop.f32.mrf.mxu1 }
 0x1da   : > { %v1059_v0 = vadd.f32 %v1481_v43, %v1058_v63  ;;  %1647 = vmatprep.mubr.msk.f32.mxu0 %vm913_vm1, %v1111_v60  ;;  %v1114_v4 = vmax.f32 %v1064_v62, 0.0 }
 0x1db   : > { %v1623_v2 = vpop.f32.mrf.mxu1  ;;  %1648 = vmatmul.mubr.msk.f32.gmra.mxu0 %vm913_vm1, %v1112_v61 }
 0x1dc   : > { %v1113_v3 = vmax.f32 %v1059_v0, 0.0  ;;  %v1074_v5 = vadd.f32 %v1623_v2, %v1481_v43 }
 0x1dd   : > { %v1068_v6 = vpop.f32.mrf.mxu1 }
 0x1de   : > { %v1069_v7 = vadd.f32 %v1481_v43, %v1068_v6  ;;  %1650 = vmatprep.mubr.msk.f32.mxu0 %vm913_vm1, %v1113_v3  ;;  %v1116_v10 = vmax.f32 %v1074_v5, 0.0 }
 0x1df   : > { %v1626_v8 = vpop.f32.mrf.mxu1  ;;  %1651 = vmatmul.mubr.msk.f32.gmra.mxu0 %vm913_vm1, %v1114_v4 }
 0x1e0   : > { %v1115_v9 = vmax.f32 %v1069_v7, 0.0  ;;  %v1084_v11 = vadd.f32 %v1626_v8, %v1481_v43 }
 0x1e1   : > { %v1078_v12 = vpop.f32.mrf.mxu1 }
 0x1e2   : > { %v1079_v13 = vadd.f32 %v1481_v43, %v1078_v12  ;;  %1653 = vmatprep.mubr.msk.f32.mxu0 %vm913_vm1, %v1115_v9  ;;  %v1118_v16 = vmax.f32 %v1084_v11, 0.0 }
 0x1e3   : > { %v1629_v14 = vpop.f32.mrf.mxu1  ;;  %1654 = vmatmul.mubr.msk.f32.gmra.mxu0 %vm913_vm1, %v1116_v10 }
 0x1e4   : > { %v1117_v15 = vmax.f32 %v1079_v13, 0.0  ;;  %v1094_v17 = vadd.f32 %v1629_v14, %v1481_v43 }
 0x1e5   : > { %v1088_v18 = vpop.f32.mrf.mxu1 }
 0x1e6   : > { %v1089_v19 = vadd.f32 %v1481_v43, %v1088_v18  ;;  %1656 = vmatprep.mubr.msk.f32.mxu0 %vm913_vm1, %v1117_v15  ;;  %v1120_v22 = vmax.f32 %v1094_v17, 0.0 }
 0x1e7   : > { %v1632_v20 = vpop.f32.mrf.mxu1  ;;  %1657 = vmatmul.mubr.msk.f32.gmra.mxu0 %vm913_vm1, %v1118_v16 }
 0x1e8   : > { %v1119_v21 = vmax.f32 %v1089_v19, 0.0  ;;  %v1104_v23 = vadd.f32 %v1632_v20, %v1481_v43 }
 0x1e9   : > { %v1098_v24 = vpop.f32.mrf.mxu1 }
 0x1ea   : > { %v1099_v25 = vadd.f32 %v1481_v43, %v1098_v24  ;;  %1659 = vmatprep.mubr.msk.f32.mxu0 %vm913_vm1, %v1119_v21  ;;  %v1122_v27 = vmax.f32 %v1104_v23, 0.0 }
 0x1eb   : > { %1660 = vmatmul.mubr.msk.f32.gmra.mxu0 %vm913_vm1, %v1120_v22 }
 0x1ec   : > { %v1121_v26 = vmax.f32 %v1099_v25, 0.0 }
 0x1ee   : > { %1662 = vmatprep.mubr.msk.f32.mxu0 %vm913_vm1, %v1121_v26 }
 0x1ef   : > { %1663 = vmatmul.mubr.msk.f32.gmra.mxu0 %vm913_vm1, %v1122_v27 }
 0x293   : > { %v1643_v29 = vpop.f32.mrf.mxu0 }
 0x294   : > { %v1254_v30 = vadd.f32 %v1643_v29, %v1498_v28 }
 0x295   : > { %v1248_v31 = vpop.f32.mrf.mxu0 }
 0x296   : > { %1328 = vst [vmem:[%s2083_s11 + $0x8] sm:$0xff] %v1254_v30  ;;  %v1249_v32 = vadd.f32 %v1498_v28, %v1248_v31 }
 0x297   : > { %v1646_v33 = vpop.f32.mrf.mxu0 }
 0x298   : > { %1327 = vst [vmem:[%s2083_s11] sm:$0xff] %v1249_v32  ;;  %v1264_v34 = vadd.f32 %v1646_v33, %v1498_v28 }
 0x299   : > { %v1258_v35 = vpop.f32.mrf.mxu0 }
 0x29a   : > { %1330 = vst [vmem:[%s2083_s11 + $0x18] sm:$0xff] %v1264_v34  ;;  %v1259_v36 = vadd.f32 %v1498_v28, %v1258_v35 }
 0x29b   : > { %v1649_v37 = vpop.f32.mrf.mxu0 }
 0x29c   : > { %1329 = vst [vmem:[%s2083_s11 + $0x10] sm:$0xff] %v1259_v36  ;;  %v1274_v38 = vadd.f32 %v1649_v37, %v1498_v28 }
 0x29d   : > { %v1268_v39 = vpop.f32.mrf.mxu0 }
 0x29e   : > { %1332 = vst [vmem:[%s2083_s11 + $0x28] sm:$0xff] %v1274_v38  ;;  %v1269_v40 = vadd.f32 %v1498_v28, %v1268_v39 }
 0x29f   : > { %v1652_v41 = vpop.f32.mrf.mxu0 }
 0x2a0   : > { %1331 = vst [vmem:[%s2083_s11 + $0x20] sm:$0xff] %v1269_v40  ;;  %v1284_v42 = vadd.f32 %v1652_v41, %v1498_v28 }
 0x2a1   : > { %v1278_v43 = vpop.f32.mrf.mxu0 }
 0x2a2   : > { %1334 = vst [vmem:[%s2083_s11 + $0x38] sm:$0xff] %v1284_v42  ;;  %v1279_v44 = vadd.f32 %v1498_v28, %v1278_v43 }
 0x2a3   : > { %v1655_v45 = vpop.f32.mrf.mxu0 }
 0x2a4   : > { %1333 = vst [vmem:[%s2083_s11 + $0x30] sm:$0xff] %v1279_v44  ;;  %v1294_v46 = vadd.f32 %v1655_v45, %v1498_v28 }
 0x2a5   : > { %v1288_v47 = vpop.f32.mrf.mxu0 }
 0x2a6   : > { %1336 = vst [vmem:[%s2083_s11 + $0x48] sm:$0xff] %v1294_v46  ;;  %v1289_v48 = vadd.f32 %v1498_v28, %v1288_v47 }
 0x2a7   : > { %v1658_v49 = vpop.f32.mrf.mxu0 }
 0x2a8   : > { %1335 = vst [vmem:[%s2083_s11 + $0x40] sm:$0xff] %v1289_v48  ;;  %v1304_v50 = vadd.f32 %v1658_v49, %v1498_v28 }
 0x2a9   : > { %v1298_v51 = vpop.f32.mrf.mxu0 }
 0x2aa   : > { %1338 = vst [vmem:[%s2083_s11 + $0x58] sm:$0xff] %v1304_v50  ;;  %v1299_v1 = vadd.f32 %v1498_v28, %v1298_v51 }
 0x2ab   : > { %v1661_v52 = vpop.f32.mrf.mxu0 }
 0x2ac   : > { %1337 = vst [vmem:[%s2083_s11 + $0x50] sm:$0xff] %v1299_v1  ;;  %v1314_v53 = vadd.f32 %v1661_v52, %v1498_v28 }
 0x2ad   : > { %v1308_v54 = vpop.f32.mrf.mxu0 }
 0x2ae   : > { %1340 = vst [vmem:[%s2083_s11 + $0x68] sm:$0xff] %v1314_v53  ;;  %v1309_v55 = vadd.f32 %v1498_v28, %v1308_v54 }
 0x2af   : > { %v1664_v56 = vpop.f32.mrf.mxu0 }
 0x2b0   : > { %1339 = vst [vmem:[%s2083_s11 + $0x60] sm:$0xff] %v1309_v55  ;;  %v1324_v57 = vadd.f32 %v1664_v56, %v1498_v28 }
 0x2b1   : > { %v1318_v58 = vpop.f32.mrf.mxu0 }
 0x2b2   : > { %1342 = vst [vmem:[%s2083_s11 + $0x78] sm:$0xff] %v1324_v57  ;;  %v1319_v59 = vadd.f32 %v1498_v28, %v1318_v58 }
 0x2b4   : > { %1341 = vst [vmem:[%s2083_s11 + $0x70] sm:$0xff] %v1319_v59 }
 0x2b5 PF: > { %p14_p9 = scmp.ge.s32.totalorder %s1772_s28, 4   ;;  %s2119_s24 = smov %s1709_s25 }
 0x2b6   : > { %s2120_s25 = smov %s1781_s8  ;;  %s2121_s26 = smov %s1772_s28 }
 0x2b7   :  { %16 = sbr.rel (!%p14_p9) target bundleno = 2 (0x2), region = 124 }

</bundles_post_ra>
